<compile_context>
chip_gen: v7x
topology: tpu7x:2x2x1
jax: 0.10.0
libtpu: 0.0.40
codegen_flags: <defaults>
</compile_context>

<pallas_src>
import functools

import jax
import jax.numpy as jnp
from jax.experimental import pallas as pl
from jax.experimental.pallas import tpu as pltpu

LANES = 128
SUBLANES = 8
ACC_ROWS = 64                 # rows per in-kernel accumulation group
MIN_ROWS_PER_CHUNK = 2048     # >= 1 MiB of f32 per chunk before splitting
_MIB = 1024 * 1024


def _cdiv(a, b):
    return -(-a // b)


def _round_up(x, m):
    return _cdiv(x, m) * m


def _device_defaults():
    """Per-generation (num_chunks, max_block_rows).

    v7x : 2 TensorCores share HBM -> size-2 "parallel" chunk axis; 64 MiB
          physical VMEM -> cap blocks at 8192 rows (4 MiB f32 per input block,
          16 MiB with double buffering).
    v5e / v6e : single TensorCore (a chunk split is pure overhead) and 128 MiB
          VMEM -> 16384-row blocks (8 MiB per input block, 32 MiB buffered).
    unknown : conservative single chunk, 8192-row blocks.
    """
    num_chunks, max_block_rows = 1, 8192
    try:
        kind = jax.devices()[0].device_kind.lower()
    except Exception:
        kind = ""
    if "v7" in kind:
        # TODO(synk): confirm with xprof that the "parallel" chunk axis really
        # shards across both v7x TensorCores; otherwise switch this axis to
        # pltpu.CORE_PARALLEL / pl.core_map for the 2-way split.
        num_chunks, max_block_rows = 2, 8192
    elif "v5" in kind or "v6" in kind:
        num_chunks, max_block_rows = 1, 16384
    return num_chunks, max_block_rows


def _iou_kernel(o_ref, t_ref, out_ref, *, rows, block_rows, acc_rows,
                blocks_per_chunk, needs_mask):
    """Accumulates sum(o*t) and sum(o+t) into resident (acc_rows, 128) partials."""
    c = pl.program_id(0)      # chunk index            ("parallel")
    j = pl.program_id(1)      # block within the chunk ("arbitrary" reduction)

    groups = block_rows // acc_rows
    zero = jnp.float32(0.0)

    def load_group(g):
        i = g * acc_rows
        if acc_rows % SUBLANES == 0:
            i = pl.multiple_of(i, acc_rows)
        o_g = o_ref[pl.ds(i, acc_rows), :].astype(jnp.float32)
        t_g = t_ref[pl.ds(i, acc_rows), :].astype(jnp.float32)
        return o_g, t_g

    def body(g, carry):
        acc_p, acc_s = carry
        o_g, t_g = load_group(g)
        return acc_p + o_g * t_g, acc_s + (o_g + t_g)

    init = (jnp.zeros((acc_rows, LANES), jnp.float32),
            jnp.zeros((acc_rows, LANES), jnp.float32))

    if needs_mask:
        # Only the last block of the grid can be ragged; full blocks run the
        # mask-free loop and their tail step below adds exactly zero.
        block_start = (c * blocks_per_chunk + j) * block_rows
        rows_in_block = jnp.clip(rows - block_start, 0, block_rows)
        full_groups = rows_in_block // acc_rows
        rem_rows = rows_in_block - full_groups * acc_rows

        acc_p, acc_s = jax.lax.fori_loop(0, full_groups, body, init)

        # Ragged last group: clamp the group index so the vector load stays
        # inside the block; mask o/t (2 selects) before forming the products.
        g_tail = jnp.minimum(full_groups, groups - 1)
        o_g, t_g = load_group(g_tail)
        valid = jax.lax.broadcasted_iota(
            jnp.int32, (acc_rows, LANES), 0) < rem_rows
        o_g = jnp.where(valid, o_g, zero)
        t_g = jnp.where(valid, t_g, zero)
        acc_p = acc_p + o_g * t_g
        acc_s = acc_s + (o_g + t_g)
    else:
        acc_p, acc_s = jax.lax.fori_loop(0, groups, body, init)

    @pl.when(j == 0)
    def _init():
        out_ref[...] = jnp.zeros_like(out_ref)

    out_ref[0, 0] = out_ref[0, 0] + acc_p
    out_ref[0, 1] = out_ref[0, 1] + acc_s


def iou(output: jax.Array, target: jax.Array) -> jax.Array:
    """IoU exactly as the PyTorch module (returns a 0-d float32)."""
    # torch.squeeze only drops size-1 dims; full-tensor sums are unaffected,
    # so flattening reproduces the semantics exactly.
    o_flat = jnp.ravel(output)
    t_flat = jnp.ravel(target)
    n = o_flat.shape[0]
    if n == 0:
        return jnp.float32(0.0)

    # Minimal padding: only up to one lane row (128 elements) and only when N
    # is misaligned; all other irregularity (rows not a multiple of 8, ragged
    # last block) is handled by the runtime row mask inside the kernel.
    # TODO(synk): a manual-DMA (memory_space=pl.ANY) path over the flat 1-D
    # array would avoid even this copy when N % 128 != 0.
    rem = n % LANES
    if rem:
        o_flat = jnp.pad(o_flat, (0, LANES - rem))
        t_flat = jnp.pad(t_flat, (0, LANES - rem))
    rows = o_flat.shape[0] // LANES
    o2d = o_flat.reshape(rows, LANES)
    t2d = t_flat.reshape(rows, LANES)

    num_chunks, max_block_rows = _device_defaults()
    if rows < num_chunks * MIN_ROWS_PER_CHUNK:
        num_chunks = 1      # not worth splitting tiny inputs across cores

    if rows < ACC_ROWS:
        # Tiny input: one block equal to the whole array (always legal), no mask.
        acc_rows = rows
        block_rows = rows
        nblocks, blocks_per_chunk = 1, 1
        needs_mask = False
    else:
        # Streaming path: blocks are multiples of 64 rows and never larger
        # than the array, so the only irregularity is a ragged last block.
        acc_rows = ACC_ROWS
        max_rows_cap = min(max_block_rows, (rows // ACC_ROWS) * ACC_ROWS)
        nblocks = _round_up(max(_cdiv(rows, max_rows_cap), num_chunks),
                            num_chunks)
        block_rows = min(max_rows_cap,
                         _round_up(_cdiv(rows, nblocks), ACC_ROWS))
        blocks_per_chunk = nblocks // num_chunks
        needs_mask = nblocks * block_rows != rows

    nvalid_blocks = _cdiv(rows, block_rows)
    if needs_mask:
        # Clamp so the DMA of a (rare) fully-out-of-range block stays
        # in-bounds; its contribution is masked to zero inside the kernel.
        def in_map(c, j):
            return (jnp.minimum(c * blocks_per_chunk + j, nvalid_blocks - 1), 0)
    else:
        def in_map(c, j):
            return (c * blocks_per_chunk + j, 0)

    kernel = functools.partial(
        _iou_kernel, rows=rows, block_rows=block_rows, acc_rows=acc_rows,
        blocks_per_chunk=blocks_per_chunk, needs_mask=needs_mask)

    in_bytes = 2 * rows * LANES * o2d.dtype.itemsize
    out_bytes = num_chunks * 2 * acc_rows * LANES * 4
    block_bytes = block_rows * LANES * o2d.dtype.itemsize
    # 2 inputs x 2 pipeline buffers + headroom; explicit because v5e's scoped
    # default (16 MiB) is smaller than the buffers we want.
    vmem_limit = max(32 * _MIB, 4 * block_bytes + 8 * _MIB)

    parts = pl.pallas_call(
        kernel,
        out_shape=jax.ShapeDtypeStruct(
            (num_chunks, 2, acc_rows, LANES), jnp.float32),
        grid_spec=pltpu.PrefetchScalarGridSpec(
            num_scalar_prefetch=0,
            grid=(num_chunks, blocks_per_chunk),
            in_specs=[
                pl.BlockSpec((block_rows, LANES), in_map),
                pl.BlockSpec((block_rows, LANES), in_map),
            ],
            # Per-chunk partial sums, resident across the reduction axis.
            out_specs=pl.BlockSpec((1, 2, acc_rows, LANES),
                                   lambda c, j: (c, 0, 0, 0)),
        ),
        compiler_params=pltpu.CompilerParams(
            dimension_semantics=("parallel", "arbitrary"),
            vmem_limit_bytes=vmem_limit,
        ),
        cost_estimate=pl.CostEstimate(
            flops=3 * rows * LANES,
            transcendentals=0,
            bytes_accessed=in_bytes + out_bytes),
    )(o2d, t2d)

    # Tiny epilogue: cross-lane/chunk reduction + the IoU arithmetic.
    inter = jnp.sum(parts[:, 0])
    sum_ot = jnp.sum(parts[:, 1])           # = sum(output) + sum(target)
    union = sum_ot - inter + jnp.float32(1e-6)
    return inter / union


def _iou_ref(output, target):
    eps = 1e-6
    o = output.astype(jnp.float32)
    t = target.astype(jnp.float32)
    inter = jnp.sum(o * t)
    union = jnp.sum(o) + jnp.sum(t) - inter + eps
    return inter / union


if __name__ == "__main__":
    key = jax.random.PRNGKey(0)
    k1, k2, k3, k4, k5, k6 = jax.random.split(key, 6)

    # Primary check: typical UNet segmentation-style inputs (NCHW in [0, 1]).
    x_shape = (2, 4, 16, 16)
    output = jax.random.uniform(k1, x_shape, dtype=jnp.float32)
    target = (jax.random.uniform(k2, x_shape, dtype=jnp.float32) > 0.5).astype(
        jnp.float32)
    got = jax.block_until_ready(iou(output, target))
    want = _iou_ref(output, target)
    assert jnp.allclose(got, want, rtol=1e-5, atol=1e-6), (got, want)

    # Misaligned N: exercises the 128-pad path, multi-block accumulation and
    # the runtime-gated ragged-tail mask.
    y_shape = (1, 1, 1000, 1000)
    output2 = jax.random.uniform(k3, y_shape, dtype=jnp.float32)
    target2 = (jax.random.uniform(k4, y_shape, dtype=jnp.float32) > 0.5).astype(
        jnp.float32)
    got2 = jax.block_until_ready(iou(output2, target2))
    want2 = _iou_ref(output2, target2)
    assert jnp.allclose(got2, want2, rtol=1e-5, atol=1e-6), (got2, want2)

    # Aligned multi-block path (pad-free), accumulation across several blocks
    # (and the 2-chunk "parallel" split on v7x).
    z_shape = (2, 4, 512, 520)
    output3 = jax.random.uniform(k5, z_shape, dtype=jnp.float32)
    target3 = (jax.random.uniform(k6, z_shape, dtype=jnp.float32) > 0.5).astype(
        jnp.float32)
    got3 = jax.block_until_ready(iou(output3, target3))
    want3 = _iou_ref(output3, target3)
    assert jnp.allclose(got3, want3, rtol=1e-5, atol=1e-6), (got3, want3)

    print("KERNEL_OK")
</pallas_src>

<mosaic_0001>
module attributes {stable_mosaic.version = 11 : i64} {
  func.func @_iou_kernel(%arg0: i32, %arg1: i32, %arg2: memref<16x128xf32, #tpu.memory_space<vmem>>, %arg3: memref<16x128xf32, #tpu.memory_space<vmem>>, %arg4: memref<1x2x16x128xf32, #tpu.memory_space<vmem>>) attributes {dimension_semantics = [#tpu.dimension_semantics<parallel>, #tpu.dimension_semantics<arbitrary>], iteration_bounds = array<i64: 1, 1>, scalar_prefetch = 0 : i64, scratch_operands = 0 : i64, tpu.core_type = #tpu.core_type<tc>, window_params = [{transform_indices = @transform_0, window_bounds = array<i64: 16, 128>}, {transform_indices = @transform_1, window_bounds = array<i64: 16, 128>}, {transform_indices = @transform_2, window_bounds = array<i64: 1, 2, 16, 128>}]} {
    %cst = arith.constant 0.000000e+00 : f32
    %0 = vector.broadcast %cst : f32 to vector<16x128xf32>
    %cst_0 = arith.constant 0.000000e+00 : f32
    %1 = vector.broadcast %cst_0 : f32 to vector<16x128xf32>
    %c0_i32 = arith.constant 0 : i32
    %c16_i32 = arith.constant 16 : i32
    %2 = arith.muli %c0_i32, %c16_i32 : i32
    %3 = tpu.assume_multiple %2, 16 : i32
    %4 = arith.index_cast %3 : i32 to index
    %c0 = arith.constant 0 : index
    %5 = vector.load %arg2[%4, %c0] : memref<16x128xf32, #tpu.memory_space<vmem>>, vector<16x128xf32>
    %6 = arith.index_cast %3 : i32 to index
    %c0_1 = arith.constant 0 : index
    %7 = vector.load %arg3[%6, %c0_1] : memref<16x128xf32, #tpu.memory_space<vmem>>, vector<16x128xf32>
    %8 = arith.mulf %5, %7 : vector<16x128xf32>
    %9 = arith.addf %0, %8 : vector<16x128xf32>
    %10 = arith.addf %5, %7 : vector<16x128xf32>
    %11 = arith.addf %1, %10 : vector<16x128xf32>
    %c1_i32 = arith.constant 1 : i32
    %c0_i32_2 = arith.constant 0 : i32
    %12 = arith.cmpi eq, %arg1, %c0_i32_2 : i32
    %13 = arith.extui %12 : i1 to i32
    %c0_i32_3 = arith.constant 0 : i32
    %14 = arith.cmpi ne, %13, %c0_i32_3 : i32
    scf.if %14 {
      %cst_19 = arith.constant 0.000000e+00 : f32
      %27 = vector.broadcast %cst_19 : f32 to vector<1x2x16x128xf32>
      %c0_20 = arith.constant 0 : index
      %c0_21 = arith.constant 0 : index
      %c0_22 = arith.constant 0 : index
      %c0_23 = arith.constant 0 : index
      %28 = vector.load %arg4[%c0_20, %c0_21, %c0_22, %c0_23] : memref<1x2x16x128xf32, #tpu.memory_space<vmem>>, vector<1x2x16x128xf32>
      tpu.vector_store %arg4[%c0_20, %c0_21, %c0_22, %c0_23], %27 {strides = array<i32>} : memref<1x2x16x128xf32, #tpu.memory_space<vmem>>, vector<1x2x16x128xf32>,
    } else {
    }
    %c0_4 = arith.constant 0 : index
    %c0_5 = arith.constant 0 : index
    %c0_6 = arith.constant 0 : index
    %c0_7 = arith.constant 0 : index
    %15 = vector.load %arg4[%c0_4, %c0_5, %c0_6, %c0_7] : memref<1x2x16x128xf32, #tpu.memory_space<vmem>>, vector<1x1x16x128xf32>
    %16 = vector.shape_cast %15 : vector<1x1x16x128xf32> to vector<16x128xf32>
    %17 = arith.addf %16, %9 : vector<16x128xf32>
    %c0_8 = arith.constant 0 : index
    %c0_9 = arith.constant 0 : index
    %c0_10 = arith.constant 0 : index
    %c0_11 = arith.constant 0 : index
    %18 = vector.load %arg4[%c0_8, %c0_9, %c0_10, %c0_11] : memref<1x2x16x128xf32, #tpu.memory_space<vmem>>, vector<1x1x16x128xf32>
    %19 = vector.shape_cast %18 : vector<1x1x16x128xf32> to vector<16x128xf32>
    %20 = vector.shape_cast %17 : vector<16x128xf32> to vector<1x1x16x128xf32>
    tpu.vector_store %arg4[%c0_8, %c0_9, %c0_10, %c0_11], %20 {strides = array<i32>} : memref<1x2x16x128xf32, #tpu.memory_space<vmem>>, vector<1x1x16x128xf32>,
    %c0_12 = arith.constant 0 : index
    %c1 = arith.constant 1 : index
    %c0_13 = arith.constant 0 : index
    %c0_14 = arith.constant 0 : index
    %21 = vector.load %arg4[%c0_12, %c1, %c0_13, %c0_14] : memref<1x2x16x128xf32, #tpu.memory_space<vmem>>, vector<1x1x16x128xf32>
    %22 = vector.shape_cast %21 : vector<1x1x16x128xf32> to vector<16x128xf32>
    %23 = arith.addf %22, %11 : vector<16x128xf32>
    %c0_15 = arith.constant 0 : index
    %c1_16 = arith.constant 1 : index
    %c0_17 = arith.constant 0 : index
    %c0_18 = arith.constant 0 : index
    %24 = vector.load %arg4[%c0_15, %c1_16, %c0_17, %c0_18] : memref<1x2x16x128xf32, #tpu.memory_space<vmem>>, vector<1x1x16x128xf32>
    %25 = vector.shape_cast %24 : vector<1x1x16x128xf32> to vector<16x128xf32>
    %26 = vector.shape_cast %23 : vector<16x128xf32> to vector<1x1x16x128xf32>
    tpu.vector_store %arg4[%c0_15, %c1_16, %c0_17, %c0_18], %26 {strides = array<i32>} : memref<1x2x16x128xf32, #tpu.memory_space<vmem>>, vector<1x1x16x128xf32>,
    return
  }
  func.func @transform_0(%arg0: i32, %arg1: i32) -> (i32, i32) {
    %c1_i32 = arith.constant 1 : i32
    %0 = arith.muli %arg0, %c1_i32 : i32
    %1 = arith.addi %0, %arg1 : i32
    %c0_i32 = arith.constant 0 : i32
    %c0_i32_0 = arith.constant 0 : i32
    return %1, %c0_i32 : i32, i32
  }
  func.func @transform_1(%arg0: i32, %arg1: i32) -> (i32, i32) {
    %c1_i32 = arith.constant 1 : i32
    %0 = arith.muli %arg0, %c1_i32 : i32
    %1 = arith.addi %0, %arg1 : i32
    %c0_i32 = arith.constant 0 : i32
    %c0_i32_0 = arith.constant 0 : i32
    return %1, %c0_i32 : i32, i32
  }
  func.func @transform_2(%arg0: i32, %arg1: i32) -> (i32, i32, i32, i32) {
    %c0_i32 = arith.constant 0 : i32
    %c0_i32_0 = arith.constant 0 : i32
    %c0_i32_1 = arith.constant 0 : i32
    %c0_i32_2 = arith.constant 0 : i32
    return %arg0, %c0_i32, %c0_i32_0, %c0_i32_1 : i32, i32, i32, i32
  }
}

</mosaic_0001>

<bundles_post_ra>
// kernel: tpu_custom_call.1
= control target key start
LH: loop header
LB: loop body
LE: loop exit
PB: predicated region body
PF: predicated region fallthrough
CT: control target
= control target key end

     0   :  { %7 = vsyncpa [#allocation3], 0  ;;  %s246_s0 = inlined_call_operand.hbm [shape: f32[16,128], index: 0, kind: input, shape index: {}]   ;;  %s247_s1 = inlined_call_operand.hbm [shape: f32[16,128], index: 1, kind: input, shape index: {}]   ;;  %s248_s2 = inlined_call_operand.hbm [shape: f32[1,2,16,128], index: 2, kind: output, shape index: {}]  }
   0x1   :  { %8 = vsyncpa [#allocation6], 0 }
   0x2   :  { %9 = vsyncpa [#allocation4], 0  ;;  %s181_s9 = smov [#allocation2]   ;;  %s109_s13 = scalar_lea.hbm %s246_s0, 256 }
   0x3   :  { %s19_s10 = sshll.u32 %s181_s9, 4  ;;  %p110_p0 = scmp.ne.s32.totalorder %s246_s0, %s109_s13  ;;  %s20_s10 = int_to_ptr.vmem [resolvable:$true] %s19_s10 }
   0x4   :  { %p113_p1 = scmp.lt.u32.totalorder %s109_s13, %s246_s0 }
   0x6   :  { %p115_p2 = pnand %p113_p1, %p110_p0 }
   0x8   :  { %118 = shalt.err (!%p115_p2)
}
   0x9   :  { %s119_s18 = scalar_lea.vmem %s20_s10, 256  ;;  %p124_p4 = scmp.lt.s32.totalorder %s20_s10, %s20_s10 }
   0xa   :  { %p120_p3 = scmp.ne.s32.totalorder %s20_s10, %s119_s18  ;;  %p125_p5 = scmp.lt.s32.totalorder %s119_s18, %s119_s18 }
   0xc   :  { %p126_p6 = por %p125_p5, %p124_p4 }
   0xe   :  { %p127_p7 = pnand %p126_p6, %p120_p3 }
  0x10   :  { %130 = shalt.err (!%p127_p7)
}
  0x11   :  { %s182_s19 = smov 128   ;;  %s183_s20 = smov 8  }
  0x12   :  { %25 = dma.hbm_to_vmem [thread:$0]  %s246_s0, 256, %s20_s10, [#allocation3], %s182_s19, %s182_s19, %s183_s20  }
  0x13   :  { %s184_s23 = smov [#allocation5]   ;;  %s131_s27 = scalar_lea.hbm %s247_s1, 256 }
  0x14   :  { %s35_s24 = sshll.u32 %s184_s23, 4  ;;  %p132_p8 = scmp.ne.s32.totalorder %s247_s1, %s131_s27  ;;  %s36_s24 = int_to_ptr.vmem [resolvable:$true] %s35_s24 }
  0x15   :  { %p135_p9 = scmp.lt.u32.totalorder %s131_s27, %s247_s1 }
  0x17   :  { %p137_p10 = pnand %p135_p9, %p132_p8 }
  0x19   :  { %140 = shalt.err (!%p137_p10)
}
  0x1a   :  { %s141_s4 = scalar_lea.vmem %s36_s24, 256  ;;  %p146_p12 = scmp.lt.s32.totalorder %s36_s24, %s36_s24 }
  0x1b   :  { %p142_p11 = scmp.ne.s32.totalorder %s36_s24, %s141_s4  ;;  %p147_p13 = scmp.lt.s32.totalorder %s141_s4, %s141_s4 }
  0x1d   :  { %p148_p0 = por %p147_p13, %p146_p12 }
  0x1f   :  { %p149_p1 = pnand %p148_p0, %p142_p11 }
  0x21   :  { %152 = shalt.err (!%p149_p1)
}
  0x22   :  { %41 = dma.hbm_to_vmem [thread:$0]  %s247_s1, 256, %s36_s24, [#allocation6], %s182_s19, %s182_s19, %s183_s20  }
  0x23   :  { %175 = dma.done.wait [#allocation3], 256  }
  0x24   :  { %176 = vsyncadd [#allocation3], 4294967040 }
  0x25   :  { %177 = dma.done.wait [#allocation6], 256  }
  0x26   :  { %178 = vsyncadd [#allocation6], 4294967040  ;;  %v52_v0 = vld [vmem:[#allocation2] sm:$0xff]  ;;  %v54_v1 = vld [vmem:[#allocation5] sm:$0xff]  ;;  %s185_s6 = smov [#allocation7]  }
  0x27   :  { %v53_v2 = vld [vmem:[#allocation2 + $0x8] sm:$0xff]  ;;  %v56_v3 = vmul.f32 %v54_v1, %v52_v0  ;;  %v55_v4 = vld [vmem:[#allocation5 + $0x8] sm:$0xff]  ;;  %v60_v5 = vadd.f32 %v54_v1, %v52_v0  ;;  %s90_s7 = sshll.u32 %s185_s6, 4  ;;  %s91_s7 = int_to_ptr.vmem [resolvable:$true] %s90_s7 }
  0x28   :  { %v57_v6 = vmul.f32 %v55_v4, %v53_v2  ;;  %v61_v7 = vadd.f32 %v55_v4, %v53_v2  ;;  %s153_s1 = scalar_lea.vmem %s91_s7, 512  ;;  %p158_p3 = scmp.lt.s32.totalorder %s91_s7, %s91_s7 }
  0x29   :  { %76 = vst [vmem:[#allocation7] sm:$0xff] %v56_v3  ;;  %83 = vst [vmem:[#allocation7 + $0x10] sm:$0xff] %v60_v5  ;;  %p154_p2 = scmp.ne.s32.totalorder %s91_s7, %s153_s1  ;;  %p159_p4 = scmp.lt.s32.totalorder %s153_s1, %s153_s1 }
  0x2a   :  { %77 = vst [vmem:[#allocation7 + $0x8] sm:$0xff] %v57_v6  ;;  %84 = vst [vmem:[#allocation7 + $0x18] sm:$0xff] %v61_v7 }
  0x2b   :  { %p160_p5 = por %p159_p4, %p158_p3 }
  0x2d   :  { %p161_p6 = pnand %p160_p5, %p154_p2 }
  0x2f   :  { %164 = shalt.err (!%p161_p6)
}
  0x30   :  { %s165_s10 = scalar_lea.hbm %s248_s2, 512 }
  0x31   :  { %p166_p7 = scmp.ne.s32.totalorder %s248_s2, %s165_s10  ;;  %p169_p8 = scmp.lt.u32.totalorder %s165_s10, %s248_s2 }
  0x33   :  { %p171_p9 = pnand %p169_p8, %p166_p7 }
  0x35   :  { %174 = shalt.err (!%p171_p9)
}
  0x36   :  { %96 = dma.vmem_to_hbm [thread:$0]  %s91_s7, 512, %s248_s2, [#allocation4], %s182_s19, %s182_s19, %s183_s20  }
  0x37   :  { %179 = dma.done.wait [#allocation4], 512  }
  0x38   :  { %180 = vsyncadd [#allocation4], 4294966784 }
  0x39   :  { %100 = vsyncpa [#allocation3], 1 }
  0x3a   :  { %101 = vsyncpa [#allocation6], 1 }
  0x3b   :  { %102 = vsyncpa [#allocation4], 1 }

</bundles_post_ra>
